<compile_context>
chip_gen: v7x
topology: tpu7x:2x2x1
jax: 0.10.0
libtpu: 0.0.40
codegen_flags: <defaults>
</compile_context>

<pallas_src>
import functools
import math

import jax
import jax.numpy as jnp
from jax.experimental import pallas as pl
from jax.experimental.pallas import tpu as pltpu


def _mat_gru_gate_kernel(w_ref, u_ref, x_ref, h_ref, ub_ref, ib_ref, out_ref,
                         *, num_users, block_c, activation, bias_per_block):
    """One column-block of the fused GRU gate.

    w_ref  : (R, R)        W weights          (resident, same every step)
    u_ref  : (R, R)        U weights          (resident, same every step)
    x_ref  : (R, block_c)  x columns          (this block)
    h_ref  : (R, block_c)  hidden columns     (this block)
    ub_ref : (R, 1)        user bias
    ib_ref : (R, 1)        item bias
    out_ref: (R, block_c)
    """
    j = pl.program_id(0)
    R = out_ref.shape[0]

    # Two MXU matmuls accumulated in f32:  W @ x_blk + U @ h_blk
    acc = jnp.dot(w_ref[...], x_ref[...], preferred_element_type=jnp.float32)
    acc = acc + jnp.dot(u_ref[...], h_ref[...],
                        preferred_element_type=jnp.float32)

    if bias_per_block:
        # num_users is a multiple of block_c: every block is entirely user or
        # entirely item -> scalar select of the (R, 1) bias, broadcast on add.
        use_user = (j * block_c) < num_users
        bias = jnp.where(use_user, ub_ref[...], ib_ref[...])        # (R, 1)
    else:
        # Mixed blocks possible: per-column select based on global column id.
        col = jax.lax.broadcasted_iota(jnp.int32, (R, block_c), 1) + j * block_c
        bias = jnp.where(col < num_users, ub_ref[...], ib_ref[...])  # (R, block_c)

    y = acc + bias
    if activation == "sigmoid":
        y = jax.nn.sigmoid(y)
    elif activation == "tanh":
        y = jnp.tanh(y)
    else:
        raise ValueError(f"unsupported activation: {activation}")
    out_ref[...] = y.astype(out_ref.dtype)


def _choose_block_c(c_pad128, max_block_c=512):
    """Largest multiple-of-128 divisor of c_pad128 up to max_block_c,
    preferring >= 2 grid steps (v7x megacore) when the array allows it."""
    n128 = c_pad128 // 128
    g_max = max(1, max_block_c // 128)
    g = 1
    for cand in range(min(g_max, n128), 0, -1):
        if n128 % cand == 0:
            g = cand
            break
    if n128 // g < 2 and n128 >= 2:           # keep both TensorCores busy
        for cand in range(g - 1, 0, -1):
            if n128 % cand == 0 and n128 // cand >= 2:
                g = cand
                break
    return 128 * g


def mat_gru_gate(x, hidden, params, num_users, num_items,
                 activation="sigmoid", max_block_c=512):
    R, C = x.shape
    assert hidden.shape == (R, C)
    assert num_users + num_items == C

    # Pad columns up to a multiple of 128 (zero columns -> act(bias), sliced off).
    c_pad = ((C + 127) // 128) * 128
    if c_pad != C:
        pad = ((0, 0), (0, c_pad - C))
        x_p = jnp.pad(x, pad)
        h_p = jnp.pad(hidden, pad)
    else:
        x_p, h_p = x, hidden

    block_c = _choose_block_c(c_pad, max_block_c)
    grid = (c_pad // block_c,)
    bias_per_block = (num_users % block_c == 0)

    kernel = functools.partial(_mat_gru_gate_kernel,
                               num_users=num_users,
                               block_c=block_c,
                               activation=activation,
                               bias_per_block=bias_per_block)

    # VMEM budget: resident W/U + double-buffered x/h/out tiles + padded biases.
    itemsize = 4
    need = itemsize * (2 * R * R                 # W, U
                       + 2 * 2 * R * block_c     # x, h (double-buffered)
                       + 2 * R * block_c         # out (double-buffered)
                       + 4 * ((R + 7) // 8) * 8 * 128)  # biases, padded tiles
    vmem_limit = min(max(2 * need + (4 << 20), 16 * 1024 * 1024),
                     64 * 1024 * 1024)

    cost = pl.CostEstimate(
        flops=4 * R * R * c_pad,
        transcendentals=R * c_pad,
        bytes_accessed=itemsize * (3 * R * c_pad + 2 * R * R + 2 * R),
    )

    out_p = pl.pallas_call(
        kernel,
        out_shape=jax.ShapeDtypeStruct((R, c_pad), jnp.float32),
        grid=grid,
        in_specs=[
            pl.BlockSpec((R, R), lambda j: (0, 0)),            # W (resident)
            pl.BlockSpec((R, R), lambda j: (0, 0)),            # U (resident)
            pl.BlockSpec((R, block_c), lambda j: (0, j)),      # x columns
            pl.BlockSpec((R, block_c), lambda j: (0, j)),      # hidden columns
            pl.BlockSpec((R, 1), lambda j: (0, 0)),            # user bias
            pl.BlockSpec((R, 1), lambda j: (0, 0)),            # item bias
        ],
        out_specs=pl.BlockSpec((R, block_c), lambda j: (0, j)),
        compiler_params=pltpu.CompilerParams(
            dimension_semantics=("parallel",),
            vmem_limit_bytes=vmem_limit),
        cost_estimate=cost,
    )(params["W"], params["U"], x_p, h_p, params["user_b"], params["item_b"])

    return out_p[:, :C] if c_pad != C else out_p


# -------------------- pure-JAX reference (for validation) -----------------
def mat_gru_gate_ref(x, hidden, params, num_users, num_items,
                     activation="sigmoid"):
    hp = jax.lax.Precision.HIGHEST
    W, U = params["W"], params["U"]
    ub, ib = params["user_b"], params["item_b"]
    act = jax.nn.sigmoid if activation == "sigmoid" else jnp.tanh

    user_part = act(jnp.dot(W, x[:, :num_users], precision=hp)
                    + jnp.dot(U, hidden[:, :num_users], precision=hp) + ub)
    item_part = act(jnp.dot(W, x[:, num_users:], precision=hp)
                    + jnp.dot(U, hidden[:, num_users:], precision=hp) + ib)
    return jnp.concatenate([user_part, item_part], axis=1)


def init_params(key, rows):
    """Mimics the torch module's xavier_uniform_ init."""
    k_w, k_u, k_ub, k_ib = jax.random.split(key, 4)
    bound_w = math.sqrt(6.0 / (rows + rows))
    bound_b = math.sqrt(6.0 / (rows + 1))
    return {
        "W": jax.random.uniform(k_w, (rows, rows), jnp.float32,
                                -bound_w, bound_w),
        "U": jax.random.uniform(k_u, (rows, rows), jnp.float32,
                                -bound_w, bound_w),
        "user_b": jax.random.uniform(k_ub, (rows, 1), jnp.float32,
                                     -bound_b, bound_b),
        "item_b": jax.random.uniform(k_ib, (rows, 1), jnp.float32,
                                     -bound_b, bound_b),
    }


def _run_case(key, rows, num_users, num_items, activation):
    C = num_users + num_items
    k_x, k_h, k_p = jax.random.split(key, 3)
    x = jax.random.normal(k_x, (rows, C), dtype=jnp.float32)
    hidden = jax.random.normal(k_h, (rows, C), dtype=jnp.float32)
    params = init_params(k_p, rows)

    out = mat_gru_gate(x, hidden, params, num_users, num_items,
                       activation=activation)
    out = jax.block_until_ready(out)
    ref = mat_gru_gate_ref(x, hidden, params, num_users, num_items,
                           activation=activation)

    assert out.shape == (rows, C), out.shape
    assert jnp.all(jnp.isfinite(out))
    assert jnp.allclose(out, ref, atol=2e-3, rtol=2e-3), (
        float(jnp.max(jnp.abs(out - ref))))


if __name__ == "__main__":
    key = jax.random.PRNGKey(0)
    k1, k2, k3 = jax.random.split(key, 3)

    # The torch module takes `activation` as a constructor arg; GRU gates use
    # sigmoid (update/reset) or tanh (candidate) — selectable here by string.

    # Case 1: multi-block grid (C=512 -> block_c=256, grid=2), mixed
    # user/item block (num_users=192 not aligned) -> per-element bias path.
    _run_case(k1, rows=32, num_users=192, num_items=320, activation="sigmoid")

    # Case 2: C not a multiple of 128 -> padded to 256, block_c=128, grid=2,
    # tanh activation.
    _run_case(k2, rows=32, num_users=100, num_items=60, activation="tanh")

    # Case 3: num_users aligned to block_c -> scalar block-level bias select.
    _run_case(k3, rows=16, num_users=128, num_items=128, activation="sigmoid")

    print("KERNEL_OK")
</pallas_src>

<mosaic_0001>
module attributes {stable_mosaic.version = 11 : i64} {
  func.func @_mat_gru_gate_kernel(%arg0: i32, %arg1: memref<32x32xf32, #tpu.memory_space<vmem>>, %arg2: memref<32x32xf32, #tpu.memory_space<vmem>>, %arg3: memref<32x256xf32, #tpu.memory_space<vmem>>, %arg4: memref<32x256xf32, #tpu.memory_space<vmem>>, %arg5: memref<32x1xf32, #tpu.memory_space<vmem>>, %arg6: memref<32x1xf32, #tpu.memory_space<vmem>>, %arg7: memref<32x256xf32, #tpu.memory_space<vmem>>) attributes {dimension_semantics = [#tpu.dimension_semantics<parallel>], iteration_bounds = array<i64: 2>, scalar_prefetch = 0 : i64, scratch_operands = 0 : i64, tpu.core_type = #tpu.core_type<tc>, window_params = [{pipeline_mode = #tpu.pipeline_mode<synchronous>, transform_indices = @transform_0, window_bounds = array<i64: 32, 32>}, {pipeline_mode = #tpu.pipeline_mode<synchronous>, transform_indices = @transform_1, window_bounds = array<i64: 32, 32>}, {transform_indices = @transform_2, window_bounds = array<i64: 32, 256>}, {transform_indices = @transform_3, window_bounds = array<i64: 32, 256>}, {pipeline_mode = #tpu.pipeline_mode<synchronous>, transform_indices = @transform_4, window_bounds = array<i64: 32, 1>}, {pipeline_mode = #tpu.pipeline_mode<synchronous>, transform_indices = @transform_5, window_bounds = array<i64: 32, 1>}, {transform_indices = @transform_6, window_bounds = array<i64: 32, 256>}]} {
    %c0 = arith.constant 0 : index
    %c0_0 = arith.constant 0 : index
    %0 = vector.load %arg1[%c0, %c0_0] : memref<32x32xf32, #tpu.memory_space<vmem>>, vector<32x32xf32>
    %c0_1 = arith.constant 0 : index
    %c0_2 = arith.constant 0 : index
    %1 = vector.load %arg3[%c0_1, %c0_2] : memref<32x256xf32, #tpu.memory_space<vmem>>, vector<32x256xf32>
    %cst = arith.constant dense<0.000000e+00> : vector<32x256xf32>
    %2 = tpu.matmul %0, %1, %cst {dimension_numbers = #tpu.dot_dimension_numbers<[1], [0], [0], [1], [0, 0, 1, 1], [], []>} : vector<32x32xf32>, vector<32x256xf32>, vector<32x256xf32> -> vector<32x256xf32>
    %c0_3 = arith.constant 0 : index
    %c0_4 = arith.constant 0 : index
    %3 = vector.load %arg2[%c0_3, %c0_4] : memref<32x32xf32, #tpu.memory_space<vmem>>, vector<32x32xf32>
    %c0_5 = arith.constant 0 : index
    %c0_6 = arith.constant 0 : index
    %4 = vector.load %arg4[%c0_5, %c0_6] : memref<32x256xf32, #tpu.memory_space<vmem>>, vector<32x256xf32>
    %cst_7 = arith.constant dense<0.000000e+00> : vector<32x256xf32>
    %5 = tpu.matmul %3, %4, %cst_7 {dimension_numbers = #tpu.dot_dimension_numbers<[1], [0], [0], [1], [0, 0, 1, 1], [], []>} : vector<32x32xf32>, vector<32x256xf32>, vector<32x256xf32> -> vector<32x256xf32>
    %6 = arith.addf %2, %5 : vector<32x256xf32>
    %7 = tpu.iota {dimensions = array<i32: 1>} : vector<32x256xi32>
    %c256_i32 = arith.constant 256 : i32
    %8 = arith.muli %arg0, %c256_i32 : i32
    %9 = vector.broadcast %8 : i32 to vector<32x256xi32>
    %10 = arith.addi %7, %9 : vector<32x256xi32>
    %c192_i32 = arith.constant 192 : i32
    %11 = vector.broadcast %c192_i32 : i32 to vector<32x256xi32>
    %12 = arith.cmpi slt, %10, %11 : vector<32x256xi32>
    %c0_8 = arith.constant 0 : index
    %c0_9 = arith.constant 0 : index
    %13 = vector.load %arg5[%c0_8, %c0_9] : memref<32x1xf32, #tpu.memory_space<vmem>>, vector<32x1xf32>
    %c0_10 = arith.constant 0 : index
    %c0_11 = arith.constant 0 : index
    %14 = vector.load %arg6[%c0_10, %c0_11] : memref<32x1xf32, #tpu.memory_space<vmem>>, vector<32x1xf32>
    %15 = vector.shape_cast %13 : vector<32x1xf32> to vector<32x1xf32>
    %16 = vector.broadcast %15 : vector<32x1xf32> to vector<32x256xf32>
    %17 = vector.shape_cast %14 : vector<32x1xf32> to vector<32x1xf32>
    %18 = vector.broadcast %17 : vector<32x1xf32> to vector<32x256xf32>
    %19 = arith.select %12, %16, %18 : vector<32x256xi1>, vector<32x256xf32>
    %20 = arith.addf %6, %19 : vector<32x256xf32>
    %21 = arith.negf %20 : vector<32x256xf32>
    %22 = math.exp %21 : vector<32x256xf32>
    %cst_12 = arith.constant 1.000000e+00 : f32
    %23 = vector.broadcast %cst_12 : f32 to vector<32x256xf32>
    %24 = arith.addf %23, %22 : vector<32x256xf32>
    %25 = arith.divf %23, %24 : vector<32x256xf32>
    %c0_13 = arith.constant 0 : index
    %c0_14 = arith.constant 0 : index
    %26 = vector.load %arg7[%c0_13, %c0_14] : memref<32x256xf32, #tpu.memory_space<vmem>>, vector<32x256xf32>
    tpu.vector_store %arg7[%c0_13, %c0_14], %25 {strides = array<i32>} : memref<32x256xf32, #tpu.memory_space<vmem>>, vector<32x256xf32>,
    return
  }
  func.func @transform_0(%arg0: i32) -> (i32, i32) {
    %c0_i32 = arith.constant 0 : i32
    %c0_i32_0 = arith.constant 0 : i32
    %c0_i32_1 = arith.constant 0 : i32
    return %c0_i32, %c0_i32_0 : i32, i32
  }
  func.func @transform_1(%arg0: i32) -> (i32, i32) {
    %c0_i32 = arith.constant 0 : i32
    %c0_i32_0 = arith.constant 0 : i32
    %c0_i32_1 = arith.constant 0 : i32
    return %c0_i32, %c0_i32_0 : i32, i32
  }
  func.func @transform_2(%arg0: i32) -> (i32, i32) {
    %c0_i32 = arith.constant 0 : i32
    %c0_i32_0 = arith.constant 0 : i32
    return %c0_i32, %arg0 : i32, i32
  }
  func.func @transform_3(%arg0: i32) -> (i32, i32) {
    %c0_i32 = arith.constant 0 : i32
    %c0_i32_0 = arith.constant 0 : i32
    return %c0_i32, %arg0 : i32, i32
  }
  func.func @transform_4(%arg0: i32) -> (i32, i32) {
    %c0_i32 = arith.constant 0 : i32
    %c0_i32_0 = arith.constant 0 : i32
    %c0_i32_1 = arith.constant 0 : i32
    return %c0_i32, %c0_i32_0 : i32, i32
  }
  func.func @transform_5(%arg0: i32) -> (i32, i32) {
    %c0_i32 = arith.constant 0 : i32
    %c0_i32_0 = arith.constant 0 : i32
    %c0_i32_1 = arith.constant 0 : i32
    return %c0_i32, %c0_i32_0 : i32, i32
  }
  func.func @transform_6(%arg0: i32) -> (i32, i32) {
    %c0_i32 = arith.constant 0 : i32
    %c0_i32_0 = arith.constant 0 : i32
    return %c0_i32, %arg0 : i32, i32
  }
}

</mosaic_0001>

<bundles_post_ra>
// kernel: tpu_custom_call.1
= control target key start
LH: loop header
LB: loop body
LE: loop exit
PB: predicated region body
PF: predicated region fallthrough
CT: control target
= control target key end

     0   :  { %s1438_s0 = inlined_call_operand.vmem [shape: f32[32,32], index: 0, kind: input, shape index: {}]   ;;  %s1439_s1 = inlined_call_operand.vmem [shape: f32[32,32], index: 1, kind: input, shape index: {}]   ;;  %s1440_s2 = inlined_call_operand.hbm [shape: f32[32,512], index: 2, kind: input, shape index: {}]   ;;  %s1441_s3 = inlined_call_operand.hbm [shape: f32[32,512], index: 3, kind: input, shape index: {}]   ;;  %s1442_s4 = inlined_call_operand.vmem [shape: f32[32,1], index: 4, kind: input, shape index: {}]   ;;  %s1443_s5 = inlined_call_operand.vmem [shape: f32[32,1], index: 5, kind: input, shape index: {}]   ;;  %s1444_s6 = inlined_call_operand.hbm [shape: f32[32,512], index: 6, kind: output, shape index: {}]  }
   0x1   :  { %1448 = sst [smem:[#allocation12_spill]] %s1440_s2 }
   0x2   :  { %11 = vsyncpa [#allocation3], 0 }
   0x3   :  { %13 = vsyncpa [#allocation3 + $0x1], 0 }
   0x4   :  { %14 = vsyncpa [#allocation6], 0 }
   0x5   :  { %16 = vsyncpa [#allocation6 + $0x1], 0 }
   0x6   :  { %17 = vsyncpa [#allocation4], 0 }
   0x7   :  { %19 = vsyncpa [#allocation4 + $0x1], 0  ;;  %s1112_s21 = smov 0   ;;  %s1114_s22 = smov 0  }
   0x8   :  { %s1116_s23 = smov 0   ;;  %s1118_s24 = smov 0  }
   0x9 LB: > { %s1133_s25 = sadd.s32 4294967295, %s1064_s24   ;;  %s779_s26 = sadd.s32 4294967294, %s1064_s24   ;;  %s1064_s24 = sphi %s1118_s24, %s1467_s24   ;;  %s1060_s23 = sphi %s1116_s23, %s1466_s23   ;;  %s1056_s22 = sphi %s1114_s22, %s1465_s22   ;;  %s1052_s21 = sphi %s1112_s21, %s1464_s21  }
   0xa   : > { %s1137_s27 = sadd.s32 1, %s1064_s24   ;;  %s74_s28 = sadd.s32 1, %s1060_s23 }
   0xb   : > { %s71_s29 = ssub.s32 %s1064_s24, %s1137_s27  ;;  %p81_p0 = scmp.ne.s32.totalorder %s1060_s23, %s1056_s22 }
   0xc   : > { %p72_p1 = scmp.eq.s32.totalorder %s71_s29, 0  ;;  %p82_p2 = scmp.eq.s32.totalorder %s1064_s24, 0 }
   0xd   : > { %p87_p3 = scmp.ne.s32.totalorder %s1056_s22, %s1052_s21  ;;  %p88_p4 = scmp.eq.s32.totalorder %s1133_s25, 0 }
   0xe   : > { %s1149_s30 = scalar_select %p72_p1, %s1060_s23, %s74_s28  }
   0xf   : > { %p1151_p5 = por %p82_p2, %p81_p0  ;;  %p1155_p6 = por %p88_p4, %p87_p3 }
  0x10   : > { %1449 = sst [smem:[#allocation11_spill]] %s1149_s30  ;;  %p179_p7 = scmp.eq.s32.totalorder %s1133_s25, 1 }
  0x11   : > { %s1451_s8 = scalar_select %p1155_p6, 1, 0 }
  0x12   : > { %p185_p8 = scmp.eq.s32.totalorder %s779_s26, 1  ;;  %p858_p10 = scmp.lt.s32.totalorder %s1064_s24, 2 }
  0x13   : > { %p1162_p11 = por %p179_p7, %p81_p0  ;;  %s1171_s11 = sand.u32 1, %s1060_s23  }
  0x14   : > { %p1166_p12 = por %p185_p8, %p87_p3  ;;  %s814_s12 = sshll.u32 %s1064_s24, 8 }
  0x15   : > { %s1452_s9 = scalar_select %p1162_p11, 1, 0 }
  0x16   : > { %s1453_s10 = scalar_select %p1166_p12, 1, 0 }
  0x17   : > { %s782_s13 = sshll.u32 %s1171_s11, 6  ;;  %s1454_s2 = sld [smem:[#allocation12_spill]] }
  0x18   : > { %s221_s17 = scalar_lea.vmem [#allocation2], %s782_s13  ;;  %p1186_p13 = pnand %p858_p10, %p1151_p5 }
  0x19   : > { %s228_s18 = sshll.u32 %s221_s17, 4  ;;  %s218_s20 = scalar_lea.sflag [#allocation3], %s1171_s11  ;;  %s1190_s18 = int_to_ptr.vmem [resolvable:$true] %s228_s18 }
  0x1a   : > { %p936_p2 = pneg %p1186_p13 }
  0x1d   : > { %s1180_s16 = scalar_lea.hbm %s1454_s2, %s814_s12  ;;  %s939_s7 = scalar_lea.hbm %s1454_s2, 2048 }
  0x1e   : > { %s934_s26 = scalar_lea.hbm %s1180_s16, 1024  ;;  %p940_p5 = scmp.lt.u32.totalorder %s1180_s16, %s1454_s2 }
  0x1f   : > { %p935_p1 = scmp.ne.s32.totalorder %s1180_s16, %s934_s26  ;;  %p941_p7 = scmp.lt.u32.totalorder %s939_s7, %s934_s26 }
  0x20   : > { %p943_p10 = scmp.lt.u32.totalorder %s934_s26, %s1180_s16 }
  0x21   : > { %p937_p3 = pnand %p936_p2, %p935_p1  ;;  %p942_p8 = por %p941_p7, %p940_p5 }
  0x23   : > { %p938_p4 = pneg %p937_p3  ;;  %p944_p9 = por %p943_p10, %p942_p8 }
  0x25   : > { %p945_p0 = pnand %p944_p9, %p938_p4 }
  0x27   : > { %948 = shalt.err (!%p945_p0)
}
  0x28   : > { %s949_s17 = scalar_lea.vmem %s1190_s18, 1024  ;;  %s1066_s28 = smov [#allocation2]  }
  0x29   : > { %p950_p1 = scmp.ne.s32.totalorder %s1190_s18, %s949_s17  ;;  %s954_s29 = sshll.u32 %s1066_s28, 4  ;;  %s955_s29 = int_to_ptr.vmem [resolvable:$false] %s954_s29 }
  0x2a   : > { %s956_s14 = scalar_lea.vmem %s955_s29, 2048  ;;  %p957_p11 = scmp.lt.s32.totalorder %s1190_s18, %s955_s29 }
  0x2b   : > { %p952_p3 = pnand %p950_p1, %p936_p2  ;;  %p958_p5 = scmp.lt.s32.totalorder %s956_s14, %s949_s17 }
  0x2d   : > { %p953_p12 = pneg %p952_p3  ;;  %p959_p7 = por %p958_p5, %p957_p11 }
  0x2f   : > { %p960_p8 = pnand %p959_p7, %p953_p12 }
  0x31   : > { %963 = shalt.err (!%p960_p8)
}
  0x32   : > { %s1446_s26 = smov 512   ;;  %s1068_s7 = smov 256  }
  0x33   : > { %s1069_s15 = smov 16   ;;  %p257_p9 = scmp.lt.s32.totalorder %s1064_s24, 3 }
  0x34   : > { %850 = dma.hbm_to_vmem [thread:$0]  (!%p1186_p13), %s1180_s16, 1024, %s1190_s18, %s218_s20, %s1446_s26, %s1068_s7, %s1069_s15  }
  0x35   : > { %s1230_s29 = scalar_lea.hbm %s1441_s3, %s814_s12  ;;  %p1456_p11 = scmp.ge.s32.totalorder %s1064_s24, 1 }
  0x36   : > { %s242_s2 = scalar_lea.vmem [#allocation5], %s782_s13  ;;  %s239_s16 = scalar_lea.sflag [#allocation6], %s1171_s11 }
  0x37   : > { %p1234_p12 = pnand %p1456_p11, %p257_p9  ;;  %s249_s30 = sshll.u32 %s242_s2, 4  ;;  %s1240_s30 = int_to_ptr.vmem [resolvable:$true] %s249_s30 }
  0x38   : > { %s964_s18 = scalar_lea.hbm %s1230_s29, 1024  ;;  %s969_s17 = scalar_lea.hbm %s1441_s3, 2048 }
  0x39   : > { %p965_p0 = scmp.ne.s32.totalorder %s1230_s29, %s964_s18  ;;  %p970_p1 = scmp.lt.u32.totalorder %s1230_s29, %s1441_s3 }
  0x3a   : > { %p971_p3 = scmp.lt.u32.totalorder %s969_s17, %s964_s18  ;;  %p973_p7 = scmp.lt.u32.totalorder %s964_s18, %s1230_s29 }
  0x3b   : > { %p967_p4 = pnand %p965_p0, %p936_p2 }
  0x3c   : > { %p972_p5 = por %p971_p3, %p970_p1 }
  0x3d   : > { %p968_p10 = pneg %p967_p4 }
  0x3e   : > { %p974_p8 = por %p973_p7, %p972_p5 }
  0x40   : > { %p975_p9 = pnand %p974_p8, %p968_p10 }
  0x42   : > { %978 = shalt.err (!%p975_p9)
}
  0x43   : > { %s979_s2 = scalar_lea.vmem %s1240_s30, 1024  ;;  %s1070_s13 = smov [#allocation5]  }
  0x44   : > { %p980_p11 = scmp.ne.s32.totalorder %s1240_s30, %s979_s2  ;;  %s984_s12 = sshll.u32 %s1070_s13, 4  ;;  %s985_s12 = int_to_ptr.vmem [resolvable:$false] %s984_s12 }
  0x45   : > { %s986_s26 = scalar_lea.vmem %s985_s12, 2048  ;;  %p987_p6 = scmp.lt.s32.totalorder %s1240_s30, %s985_s12 }
  0x46   : > { %p982_p0 = pnand %p980_p11, %p936_p2  ;;  %p988_p1 = scmp.lt.s32.totalorder %s986_s26, %s979_s2 }
  0x48   : > { %p983_p4 = pneg %p982_p0  ;;  %p989_p3 = por %p988_p1, %p987_p6 }
  0x4a   : > { %p990_p5 = pnand %p989_p3, %p983_p4 }
  0x4c   : > { %993 = shalt.err (!%p990_p5)
}
  0x4d   : > { %s1458_s18 = smov 512   ;;  %261 = sbr.rel (%p1234_p12) target bundleno = 373 (0x175), region = 44 }
  0x4e   : > { %853 = dma.hbm_to_vmem [thread:$0]  (!%p1186_p13), %s1230_s29, 1024, %s1240_s30, %s239_s16, %s1458_s18, %s1068_s7, %s1069_s15  }
  0x4f   : > { %s1274_s20 = sand.u32 (!%p1234_p12), 1, %s1056_s22   ;;  %p1459_p6 = scmp.ne.s32.totalorder (!%p1234_p12), %s1451_s8, 0 }
  0x50   : > { %s1277_s17 = sshll.u32 (!%p1234_p12), %s1274_s20, 6  ;;  %s264_s19 = scalar_lea.sflag (!%p1234_p12), [#allocation3], %s1274_s20 }
  0x51   : > { %s1281_s28 = scalar_lea.vmem (!%p1234_p12), [#allocation2], %s1277_s17 }
  0x54   : > { %1039 = dma.done.wait (%p1459_p6), %s264_s19, 1024  }
  0x55   : > { %1041 = vsyncadd (%p1459_p6), %s264_s19, 4294966272  ;;  %s273_s30 = scalar_lea.sflag [#allocation6], %s1274_s20  ;;  %s1289_s11 = scalar_lea.vmem [#allocation5], %s1277_s17 }
  0x56   : > { %1043 = dma.done.wait (%p1459_p6), %s273_s30, 1024  }
  0x57   : > { %1045 = vsyncadd (%p1459_p6), %s273_s30, 4294966272  ;;  %v1071_v0 = vmov 0.0   ;;  %v1072_v1 = vmov 0   ;;  %v330_v2 = vld [vmem:[%s1289_s11 + $0x8] sm:$0xff]  ;;  %v332_v3 = vld [vmem:[%s1289_s11 + $0x18] sm:$0xff]  ;;  %vm337_vm0 = vcmask 261120   ;;  %v540_v42 = vlaneseq }
  0x58   : > { %414 = vmatprep.mubr.f32.mxu1 %v1071_v0  ;;  %515 = vmatprep.mubr.f32.mxu0 %v1071_v0  ;;  %v318_v4 = vld [vmem:[%s1281_s28 + $0x8] sm:$0xff]  ;;  %v817_v5 = vpack.c.bf16 %v332_v3, %v330_v2  ;;  %v320_v6 = vld [vmem:[%s1281_s28 + $0x18] sm:$0xff]  ;;  %v329_v7 = vld [vmem:[%s1289_s11] sm:$0xff]  ;;  %s800_s15 = sshll.u32 %s1133_s25, 8  ;;  %s309_s29 = scalar_lea.vmem [#allocation7], %s1277_s17 }
  0x59   : > { %901 = vset.pattern.permute.xlu1 %v1072_v1  ;;  %900 = vset.pattern.permute.xlu0 %v1072_v1  ;;  %v331_v8 = vld [vmem:[%s1289_s11 + $0x10] sm:$0xff]  ;;  %v825_v9 = vpack.c.bf16 %v320_v6, %v318_v4  ;;  %v317_v11 = vld [vmem:[%s1281_s28] sm:$0xff]  ;;  %v334_v13 = vld [vmem:[%s1289_s11 + $0x28] sm:$0xff]  ;;  %v541_v43 = vand.u32 127, %v540_v42  ;;  %v544_v46 = vstv %s800_s15  ;;  %s683_s14 = sshll.u32 %s309_s29, 4  ;;  %s1392_s2 = scalar_lea.hbm %s1444_s6, %s800_s15  ;;  %s1394_s14 = int_to_ptr.vmem [resolvable:$true] %s683_s14 }
  0x5a   : > { %v819_v10 = vpack.c.bf16 %v331_v8, %v329_v7  ;;  %v319_v12 = vld [vmem:[%s1281_s28 + $0x10] sm:$0xff]  ;;  %818 = vmatprep.subr.bf16.mxu1 %v817_v5  ;;  %v336_v15 = vld [vmem:[%s1289_s11 + $0x38] sm:$0xff]  ;;  %v322_v16 = vld [vmem:[%s1281_s28 + $0x28] sm:$0xff]  ;;  %s670_s13 = scalar_lea.sflag [#allocation4], %s1274_s20  ;;  %s994_s12 = scalar_lea.vmem %s1394_s14, 1024 }
  0x5b   : > { %v827_v14 = vpack.c.bf16 %v319_v12, %v317_v11  ;;  %v324_v17 = vld [vmem:[%s1281_s28 + $0x38] sm:$0xff]  ;;  %826 = vmatprep.subr.bf16.mxu0 %v825_v9  ;;  %v821_v18 = vpack.c.bf16 %v336_v15, %v334_v13  ;;  %v333_v20 = vld [vmem:[%s1289_s11 + $0x20] sm:$0xff]  ;;  %v335_v21 = vld [vmem:[%s1289_s11 + $0x30] sm:$0xff]  ;;  %v542_v45 = vadd.s32 128, %v541_v43  ;;  %v545_v49 = vadd.s32 %v544_v46, %v541_v43  ;;  %p995_p13 = scmp.ne.s32.totalorder %s1394_s14, %s994_s12  ;;  %p1460_p2 = scmp.ne.s32.totalorder %s1452_s9, 0 }
  0x5c   : > { %820 = vmatpush1.bf16.msra.mxu1 %v819_v10  ;;  %v829_v19 = vpack.c.bf16 %v324_v17, %v322_v16  ;;  %v321_v22 = vld [vmem:[%s1281_s28 + $0x20] sm:$0xff]  ;;  %v823_v23 = vpack.c.bf16 %v335_v21, %v333_v20  ;;  %v323_v24 = vld [vmem:[%s1281_s28 + $0x30] sm:$0xff]  ;;  %v552_v30 = vld [vmem:[%s1442_s4 + $0x18] sm:$0xff]  ;;  %s1073_s25 = smov [#allocation7]  }
  0x5d   : > { %828 = vmatpush1.bf16.msra.mxu0 %v827_v14  ;;  %822 = vmatprep.subr.bf16.mxu1 %v821_v18  ;;  %v831_v25 = vpack.c.bf16 %v323_v24, %v321_v22  ;;  %v325_v26 = vld [vmem:[%s1439_s1] sm:$0xff]  ;;  %v551_v27 = vld [vmem:[%s1442_s4 + $0x10] sm:$0xff]  ;;  %v550_v31 = vld [vmem:[%s1442_s4 + $0x8] sm:$0xff]  ;;  %v546_v50 = vadd.s32 %v544_v46, %v542_v45  ;;  %vm547_vm1 = vcmp.lt.s32.totalorder %v545_v49, 192  ;;  %p996_p12 = pnand %p995_p13, %p1460_p2  ;;  %s998_s26 = sshll.u32 %s1073_s25, 4  ;;  %s999_s26 = int_to_ptr.vmem [resolvable:$false] %s998_s26 }
  0x5e   : > { %830 = vmatprep.subr.bf16.mxu0 %v829_v19  ;;  %v549_v28 = vld [vmem:[%s1442_s4] sm:$0xff]  ;;  %569 = vperm.xlu1 %901, %v551_v27   ;;  %v326_v32 = vld [vmem:[%s1439_s1 + $0x8] sm:$0xff]  ;;  %v327_v36 = vld [vmem:[%s1439_s1 + $0x10] sm:$0xff]  ;;  %s1000_s18 = scalar_lea.vmem %s999_s26, 2048  ;;  %p1001_p7 = scmp.lt.s32.totalorder %s1394_s14, %s999_s26 }
  0x5f   : > { %v313_v29 = vld [vmem:[%s1438_s0] sm:$0xff]  ;;  %559 = vperm.xlu0 %900, %v549_v28   ;;  %v314_v33 = vld [vmem:[%s1438_s0 + $0x8] sm:$0xff]  ;;  %v315_v37 = vld [vmem:[%s1438_s0 + $0x10] sm:$0xff]  ;;  %vm548_vm2 = vcmp.lt.s32.totalorder %v546_v50, 192  ;;  %p997_p10 = pneg %p996_p12  ;;  %p1002_p8 = scmp.lt.s32.totalorder %s1000_s18, %s994_s12 }
  0x60   : > { %824 = vmatpush1.bf16.msra.mxu1 %v823_v23  ;;  %v554_v34 = vld [vmem:[%s1443_s5 + $0x8] sm:$0xff]  ;;  %v553_v35 = vld [vmem:[%s1443_s5] sm:$0xff]  ;;  %v556_v38 = vld [vmem:[%s1443_s5 + $0x18] sm:$0xff] }
  0x61   : > { %832 = vmatpush1.bf16.msra.mxu0 %v831_v25  ;;  %v555_v39 = vld [vmem:[%s1443_s5 + $0x10] sm:$0xff]  ;;  %v328_v40 = vld [vmem:[%s1439_s1 + $0x18] sm:$0xff]  ;;  %p1003_p9 = por %p1002_p8, %p1001_p7 }
  0x62   : > { %574 = vperm.xlu1 %901, %v552_v30   ;;  %v316_v41 = vld [vmem:[%s1438_s0 + $0x18] sm:$0xff] }
  0x63   : > { %792 = vmatmul.mubr.msk.f32.vlgmr.msra.gmra.mrb[0].mxu1 %vm337_vm0, %v325_v26  ;;  %564 = vperm.xlu0 %900, %v550_v31   ;;  %p1004_p11 = pnand %p1003_p9, %p997_p10 }
  0x64   : > { %796 = vmatmul.mubr.msk.f32.vlgmr.msra.gmra.mrb[0].mxu0 %vm337_vm0, %v313_v29  ;;  %420 = vmatprep.mubr.f32.mxu1 %v1071_v0 }
  0x65   : > { %521 = vmatprep.mubr.f32.mxu0 %v1071_v0 }
  0x66   : > { %584 = vperm.xlu1 %901, %v554_v34  }
  0x67   : > { %793 = vmatmul.mubr.msk.f32.gmra.mrb[2].mxu1 %vm337_vm0, %v326_v32  ;;  %579 = vperm.xlu0 %900, %v553_v35  }
  0x68   : > { %797 = vmatmul.mubr.msk.f32.gmra.mrb[2].mxu0 %vm337_vm0, %v314_v33  ;;  %426 = vmatprep.mubr.f32.mxu1 %v1071_v0 }
  0x69   : > { %527 = vmatprep.mubr.f32.mxu0 %v1071_v0 }
  0x6a   : > { %594 = vperm.xlu1 %901, %v556_v38  }
  0x6b   : > { %794 = vmatmul.mubr.msk.f32.gmra.mrb[4].mxu1 %vm337_vm0, %v327_v36  ;;  %589 = vperm.xlu0 %900, %v555_v39  }
  0x6c   : > { %798 = vmatmul.mubr.msk.f32.gmra.mrb[4].mxu0 %vm337_vm0, %v315_v37  ;;  %432 = vmatprep.mubr.f32.mxu1 %v1071_v0 }
  0x6d   : > { %533 = vmatprep.mubr.f32.mxu0 %v1071_v0 }
  0x6f   : > { %795 = vmatmul.mubr.msk.f32.gmra.mrb[6].mxu1 %vm337_vm0, %v328_v40 }
  0x70   : > { %799 = vmatmul.mubr.msk.f32.gmra.mrb[6].mxu0 %vm337_vm0, %v316_v41 }
  0xdd   : > { %v570_v47 = vpop.permute.xlu1 %569 }
  0xde   : > { %v560_v44 = vpop.permute.xlu0 %559 }
  0xe1   : > { %v575_v51 = vpop.permute.xlu1 %574 }
  0xe2   : > { %v565_v48 = vpop.permute.xlu0 %564 }
  0xe5   : > { %v585_v2 = vpop.permute.xlu1 %584 }
  0xe6   : > { %v580_v52 = vpop.permute.xlu0 %579  ;;  %v599_v6 = vsel %vm547_vm1, %v565_v48, %v585_v2  ;;  %v600_v9 = vsel %vm548_vm2, %v565_v48, %v585_v2 }
  0xe7   : > { %v597_v54 = vsel %vm547_vm1, %v560_v44, %v580_v52  ;;  %v598_v57 = vsel %vm548_vm2, %v560_v44, %v580_v52 }
  0xe9   : > { %v595_v22 = vpop.permute.xlu1 %594 }
  0xea   : > { %v590_v10 = vpop.permute.xlu0 %589  ;;  %v603_v32 = vsel %vm547_vm1, %v575_v51, %v595_v22  ;;  %v604_v35 = vsel %vm548_vm2, %v575_v51, %v595_v22 }
  0xeb   : > { %v601_v19 = vsel %vm547_vm1, %v570_v47, %v590_v10  ;;  %v602_v23 = vsel %vm548_vm2, %v570_v47, %v590_v10 }
 0x136   : > { %v416_v53 = vpop.f32.mrb[0].mxu1 }
 0x137   : > { %v517_v55 = vpop.f32.mrb[0].mxu0  ;;  %v418_v56 = vpop.f32.mrb[1].mxu1 }
 0x138   : > { %v518_v58 = vadd.f32 %v517_v55, %v416_v53  ;;  %v519_v59 = vpop.f32.mrb[1].mxu0 }
 0x139   : > { %v520_v60 = vadd.f32 %v519_v59, %v418_v56 }
 0x13a   : > { %v605_v61 = vadd.f32 %v597_v54, %v518_v58  ;;  %v422_v62 = vpop.f32.mrb[2].mxu1 }
 0x13b   : > { %v606_v63 = vadd.f32 %v598_v57, %v520_v60  ;;  %v523_v0 = vpop.f32.mrb[2].mxu0  ;;  %v424_v1 = vpop.f32.mrb[3].mxu1 }
 0x13c   : > { %v801_v3 = vmul.f32 -1.442695, %v605_v61  ;;  %v524_v4 = vadd.f32 %v523_v0, %v422_v62  ;;  %v525_v5 = vpop.f32.mrb[3].mxu0 }
 0x13d   : > { %v802_v7 = vmul.f32 -1.442695, %v606_v63  ;;  %v526_v8 = vadd.f32 %v525_v5, %v424_v1 }
 0x13e   : > { %902 = vpow2.f32 %v801_v3  ;;  %v607_v11 = vadd.f32 %v599_v6, %v524_v4  ;;  %v428_v12 = vpop.f32.mrb[4].mxu1 }
 0x13f   : > { %904 = vpow2.f32 %v802_v7  ;;  %v608_v13 = vadd.f32 %v600_v9, %v526_v8  ;;  %v529_v14 = vpop.f32.mrb[4].mxu0  ;;  %v430_v15 = vpop.f32.mrb[5].mxu1 }
 0x140   : > { %v803_v16 = vmul.f32 -1.442695, %v607_v11  ;;  %v530_v17 = vadd.f32 %v529_v14, %v428_v12  ;;  %v531_v18 = vpop.f32.mrb[5].mxu0 }
 0x141   : > { %v804_v20 = vmul.f32 -1.442695, %v608_v13  ;;  %v532_v21 = vadd.f32 %v531_v18, %v430_v15 }
 0x142   : > { %906 = vpow2.f32 %v803_v16  ;;  %v609_v24 = vadd.f32 %v601_v19, %v530_v17  ;;  %v434_v25 = vpop.f32.mrb[6].mxu1 }
 0x143   : > { %908 = vpow2.f32 %v804_v20  ;;  %v610_v26 = vadd.f32 %v602_v23, %v532_v21  ;;  %v535_v27 = vpop.f32.mrb[6].mxu0  ;;  %v436_v28 = vpop.f32.mrb[7].mxu1 }
 0x144   : > { %v805_v29 = vmul.f32 -1.442695, %v609_v24  ;;  %v536_v30 = vadd.f32 %v535_v27, %v434_v25  ;;  %v537_v31 = vpop.f32.mrb[7].mxu0 }
 0x145   : > { %v806_v33 = vmul.f32 -1.442695, %v610_v26  ;;  %v538_v34 = vadd.f32 %v537_v31, %v436_v28 }
 0x146   : > { %910 = vpow2.f32 %v805_v29  ;;  %v611_v36 = vadd.f32 %v603_v32, %v536_v30 }
 0x147   : > { %912 = vpow2.f32 %v806_v33  ;;  %v612_v37 = vadd.f32 %v604_v35, %v538_v34 }
 0x148   : > { %v903_v38 = vpop.eup %902  ;;  %v807_v39 = vmul.f32 -1.442695, %v611_v36 }
 0x149   : > { %v905_v40 = vpop.eup %904  ;;  %v637_v41 = vadd.f32 1.0, %v903_v38  ;;  %v808_v42 = vmul.f32 -1.442695, %v612_v37 }
 0x14a   : > { %v638_v43 = vadd.f32 1.0, %v905_v40  ;;  %914 = vpow2.f32 %v807_v39 }
 0x14b   : > { %916 = vrcp.f32 %v637_v41 }
 0x14c   : > { %v907_v44 = vpop.eup %906  ;;  %918 = vrcp.f32 %v638_v43 }
 0x14d   : > { %v909_v45 = vpop.eup %908  ;;  %v639_v46 = vadd.f32 1.0, %v907_v44  ;;  %920 = vpow2.f32 %v808_v42 }
 0x14e   : > { %v640_v47 = vadd.f32 1.0, %v909_v45 }
 0x14f   : > { %922 = vrcp.f32 %v639_v46 }
 0x150   : > { %v911_v48 = vpop.eup %910  ;;  %924 = vrcp.f32 %v640_v47 }
 0x151   : > { %v913_v49 = vpop.eup %912  ;;  %v641_v50 = vadd.f32 1.0, %v911_v48 }
 0x152   : > { %v642_v51 = vadd.f32 1.0, %v913_v49 }
 0x153   : > { %926 = vrcp.f32 %v641_v50 }
 0x154   : > { %v915_v52 = vpop.eup %914  ;;  %928 = vrcp.f32 %v642_v51 }
 0x155   : > { %v917_v53 = vpop.eup %916  ;;  %v643_v54 = vadd.f32 1.0, %v915_v52 }
 0x156   : > { %v919_v55 = vpop.eup %918  ;;  %661 = vst [vmem:[%s309_s29] sm:$0xff] %v917_v53 }
 0x157   : > { %v921_v56 = vpop.eup %920  ;;  %662 = vst [vmem:[%s309_s29 + $0x8] sm:$0xff] %v919_v55  ;;  %930 = vrcp.f32 %v643_v54 }
 0x158   : > { %v644_v57 = vadd.f32 1.0, %v921_v56 }
 0x159   : > { %v923_v58 = vpop.eup %922 }
 0x15a   : > { %v925_v59 = vpop.eup %924  ;;  %663 = vst [vmem:[%s309_s29 + $0x10] sm:$0xff] %v923_v58  ;;  %932 = vrcp.f32 %v644_v57 }
 0x15b   : > { %664 = vst [vmem:[%s309_s29 + $0x18] sm:$0xff] %v925_v59 }
 0x15d   : > { %v927_v60 = vpop.eup %926 }
 0x15e   : > { %v929_v61 = vpop.eup %928  ;;  %665 = vst [vmem:[%s309_s29 + $0x20] sm:$0xff] %v927_v60 }
 0x15f   : > { %666 = vst [vmem:[%s309_s29 + $0x28] sm:$0xff] %v929_v61 }
 0x161   : > { %v931_v62 = vpop.eup %930 }
 0x162   : > { %667 = vst [vmem:[%s309_s29 + $0x30] sm:$0xff] %v931_v62 }
 0x164   : > { %v933_v63 = vpop.eup %932 }
 0x165   : > { %668 = vst [vmem:[%s309_s29 + $0x38] sm:$0xff] %v933_v63 }
 0x166   : > { %1007 = shalt.err (!%p1004_p11)
}
 0x167   : > { %s1008_s19 = scalar_lea.hbm %s1392_s2, 1024  ;;  %s1012_s11 = scalar_lea.hbm %s1444_s6, 2048 }
 0x168   : > { %p1009_p0 = scmp.ne.s32.totalorder %s1392_s2, %s1008_s19  ;;  %p1013_p3 = scmp.lt.u32.totalorder %s1392_s2, %s1444_s6 }
 0x169   : > { %p1014_p5 = scmp.lt.u32.totalorder %s1012_s11, %s1008_s19  ;;  %p1016_p13 = scmp.lt.u32.totalorder %s1008_s19, %s1392_s2 }
 0x16a   : > { %p1010_p4 = pnand %p1009_p0, %p1460_p2 }
 0x16b   : > { %p1015_p6 = por %p1014_p5, %p1013_p3 }
 0x16c   : > { %p1011_p1 = pneg %p1010_p4 }
 0x16d   : > { %p1017_p12 = por %p1016_p13, %p1015_p6 }
 0x16f   : > { %p1018_p10 = pnand %p1017_p12, %p1011_p1 }
 0x171   : > { %1021 = shalt.err (!%p1018_p10)
}
 0x172   : > { %s1074_s15 = smov 256   ;;  %s1075_s29 = smov 512  }
 0x173   : > { %s1076_s17 = smov 16  }
 0x174   : > { %845 = dma.vmem_to_hbm [thread:$0]  (%p1460_p2), %s1394_s14, 1024, %s1392_s2, %s670_s13, %s1074_s15, %s1075_s29, %s1076_s17  }
 0x175 PF: > { %s698_s16 = sand.u32 1, %s1052_s21   ;;  %p1461_p7 = scmp.ne.s32.totalorder %s1453_s10, 0 }
 0x176   : > { %p1462_p8 = scmp.ge.s32.totalorder %s1064_s24, 2  ;;  %s699_s12 = scalar_lea.sflag [#allocation4], %s698_s16 }
 0x178   : > { %p855_p9 = pnand %p1462_p8, %p1461_p7 }
 0x17a   : > { %1047 = dma.done.wait (!%p855_p9), %s699_s12, 1024  }
 0x17b   : > { %1049 = vsyncadd (!%p855_p9), %s699_s12, 4294966272  ;;  %s1463_s25 = sld [smem:[#allocation11_spill]]  ;;  %p22_p11 = scmp.ge.s32.totalorder %s1137_s27, 4  }
 0x17c   : > { %s1464_s21 = smov %s1056_s22  ;;  %s1465_s22 = smov %s1060_s23 }
 0x17d   : > { %s1467_s24 = smov %s1137_s27  ;;  %24 = sbr.rel (!%p22_p11) target bundleno = 9 (0x9), region = 102 }
 0x181   : > { %s1466_s23 = smov %s1463_s25 }
 0x184   :  { %704 = vsyncpa [#allocation3], 1 }
 0x185   :  { %706 = vsyncpa [#allocation3 + $0x1], 1 }
 0x186   :  { %707 = vsyncpa [#allocation6], 1 }
 0x187   :  { %709 = vsyncpa [#allocation6 + $0x1], 1 }
 0x188   :  { %710 = vsyncpa [#allocation4], 1 }
 0x189   :  { %712 = vsyncpa [#allocation4 + $0x1], 1 }

</bundles_post_ra>
